<compile_context>
chip_gen: v5e
topology: v5e:2x2
jax: 0.10.0
libtpu: 0.0.40
codegen_flags: <defaults>
</compile_context>

<pallas_src>
import jax
import jax.numpy as jnp
from jax.experimental import pallas as pl
from jax.experimental.pallas import tpu as pltpu

_SUBLANE = 8      # f32 sublane count
_MAX_TILE_B = 1024  # batch-tile ceiling (review: sweep 1024-2048; 1024 is safe)


def _round_up(n, m):
    return ((n + m - 1) // m) * m


def _make_fused_kernel(n_layers, compute_dtype):
    """Kernel signature: (att_ref, x_ref, w0, b0, ..., w{L-1}, b{L-1}, o_ref)."""
    compute_dtype = jnp.dtype(compute_dtype)
    # Full-f32 MXU path (multi-pass) when computing in f32 so results match the
    # XLA reference tightly; bf16 operands (v5e win) use the fast default path.
    precision = (jax.lax.Precision.HIGHEST
                 if compute_dtype == jnp.dtype(jnp.float32)
                 else jax.lax.Precision.DEFAULT)

    def kernel(att_ref, x_ref, *refs):
        o_ref = refs[-1]
        att = att_ref[0, 0]                      # scalar read from SMEM, once
        h = x_ref[...]
        for l in range(n_layers):
            w = refs[2 * l][...]
            b = refs[2 * l + 1][...]
            # MXU matmul with f32 accumulation; bias + ReLU fused on the VPU.
            h = jnp.dot(h.astype(compute_dtype), w.astype(compute_dtype),
                        preferred_element_type=jnp.float32,
                        precision=precision)
            h = jnp.maximum(h + b, 0.0)
        o_ref[...] = (h * att).astype(o_ref.dtype)

    return kernel


def dense_block_forward(x, att, params, out_features,
                        *, compute_dtype=jnp.float32, max_tile_b=_MAX_TILE_B):
    """Fused forward.  params: list of (W, b) with W shaped (in, out) and
    b shaped (1, out) — real (unpadded) shapes; Mosaic handles the layout."""
    B, F = x.shape
    n_layers = len(params)
    assert params[0][0].shape[0] == F, "x feature dim must match first layer"

    # Batch tiling:
    #  * tiny batches: one block covering the whole array (dims == full array
    #    are always legal block dims),
    #  * otherwise ~ceil(B/2) rounded to 8 sublanes (>=2 grid steps so both
    #    v7x TensorCores get work), capped at max_tile_b for VMEM headroom.
    if B <= _SUBLANE:
        tile_b = B
    else:
        tile_b = min(max_tile_b, _round_up(pl.cdiv(B, 2), _SUBLANE))
    grid = (pl.cdiv(B, tile_b),)   # ragged last tile handled by Pallas

    att_arr = jnp.reshape(att.astype(jnp.float32), (1, 1))

    in_specs = [
        pl.BlockSpec(memory_space=pltpu.MemorySpace.SMEM),     # att scalar
        pl.BlockSpec((tile_b, F), lambda i: (i, 0)),           # x: tiled batch
    ]
    args = [att_arr, x]
    for (w, b) in params:
        # Constant index_map: weights/biases stay VMEM-resident across tiles.
        # TODO(synk): pipeline_mode=pl.Buffered(1) would drop the redundant
        # second buffer for these constant blocks; omitted for portability.
        in_specs.append(pl.BlockSpec(w.shape, lambda i: (0, 0)))
        in_specs.append(pl.BlockSpec(b.shape, lambda i: (0, 0)))
        args.append(w)
        args.append(b)

    return pl.pallas_call(
        _make_fused_kernel(n_layers, compute_dtype),
        out_shape=jax.ShapeDtypeStruct((B, out_features), x.dtype),
        grid=grid,
        in_specs=in_specs,
        # Logical-width output (last dim == full array dim): no padded store,
        # no post-kernel feature slice.
        out_specs=pl.BlockSpec((tile_b, out_features), lambda i: (i, 0)),
        compiler_params=pltpu.CompilerParams(
            dimension_semantics=("parallel",)),
    )(*args)


class DenseBlockPallas:
    """JAX/Pallas port of the PyTorch DenseBlock.

    Layer dims follow the PyTorch module exactly: layers are built over
    hidden_layers + [output_len]; `input_size` is stored but unused for the
    layer shapes (as in the original).  Weights are stored pre-transposed as
    (in_features, out_features), unpadded.
    """

    def __init__(self, input_size, hidden_layers, output_len, key,
                 compute_dtype=jnp.float32):
        self.input_size = input_size
        self.output_len = output_len
        self.compute_dtype = compute_dtype   # jnp.bfloat16 is mainly a v5e win
        dims = list(hidden_layers) + [output_len]
        self.params = []
        for i in range(len(dims) - 1):
            fan_in, fan_out = dims[i], dims[i + 1]
            key, kw, kb = jax.random.split(key, 3)
            # nn.Linear default init: U(-1/sqrt(fan_in), 1/sqrt(fan_in))
            bound = 1.0 / (fan_in ** 0.5)
            w = jax.random.uniform(kw, (fan_in, fan_out), jnp.float32, -bound, bound)
            b = jax.random.uniform(kb, (1, fan_out), jnp.float32, -bound, bound)
            self.params.append((w, b))

    def __call__(self, x, att):
        att = jnp.asarray(att, jnp.float32)

        def run():
            return dense_block_forward(x, att, self.params, self.output_len,
                                       compute_dtype=self.compute_dtype)

        # PyTorch early-exit: batch==1 and att==0 -> zeros(1, output_len).
        # Batch is static, att is a runtime scalar -> lax.cond skips the
        # kernel launch and all HBM traffic entirely when att == 0.
        if x.shape[0] == 1:
            return jax.lax.cond(
                att == 0,
                lambda: jnp.zeros((1, self.output_len), x.dtype),
                run,
            )
        return run()

    def n_parameters(self):
        return sum(int(w.size + b.size) for (w, b) in self.params)


def _reference(params, x, att):
    h = x
    for (w, b) in params:
        h = jnp.maximum(
            jnp.dot(h, w, precision=jax.lax.Precision.HIGHEST) + b, 0.0)
    return h * att


if __name__ == "__main__":
    key = jax.random.PRNGKey(0)
    k_model, k_x = jax.random.split(key)

    B = 8
    input_size = 32            # stored but (as in the PyTorch module) unused for layer dims
    hidden_layers = [32, 64, 48]
    output_len = 16

    block = DenseBlockPallas(input_size, hidden_layers, output_len, k_model)

    x = jax.random.normal(k_x, (B, hidden_layers[0]), jnp.float32)
    att = jnp.float32(0.75)

    out = jax.block_until_ready(block(x, att))
    ref = _reference(block.params, x, att)
    assert out.shape == (B, output_len), out.shape
    assert jnp.allclose(out, ref, atol=1e-4, rtol=1e-4), "mismatch vs reference"

    # Ragged batch (not a multiple of the tile): exercises the partial last tile.
    B2 = 13
    x2 = jax.random.normal(jax.random.PRNGKey(3), (B2, hidden_layers[0]), jnp.float32)
    out2 = jax.block_until_ready(block(x2, att))
    ref2 = _reference(block.params, x2, att)
    assert out2.shape == (B2, output_len), out2.shape
    assert jnp.allclose(out2, ref2, atol=1e-4, rtol=1e-4), "ragged mismatch"

    # batch==1 early-exit branch (att == 0): kernel skipped via lax.cond.
    x1 = x[:1]
    out_zero = jax.block_until_ready(block(x1, jnp.float32(0.0)))
    assert out_zero.shape == (1, output_len)
    assert jnp.allclose(out_zero, 0.0)

    # batch==1, att != 0 path (must NOT zero out).
    out_one = jax.block_until_ready(block(x1, att))
    ref_one = _reference(block.params, x1, att)
    assert jnp.allclose(out_one, ref_one, atol=1e-4, rtol=1e-4)

    print("KERNEL_OK")
</pallas_src>

<mosaic_0001>
module attributes {stable_mosaic.version = 11 : i64} {
  func.func @kernel(%arg0: i32, %arg1: memref<1x1xf32, #tpu.memory_space<smem>>, %arg2: memref<8x32xf32, #tpu.memory_space<vmem>>, %arg3: memref<32x64xf32, #tpu.memory_space<vmem>>, %arg4: memref<1x64xf32, #tpu.memory_space<vmem>>, %arg5: memref<64x48xf32, #tpu.memory_space<vmem>>, %arg6: memref<1x48xf32, #tpu.memory_space<vmem>>, %arg7: memref<48x16xf32, #tpu.memory_space<vmem>>, %arg8: memref<1x16xf32, #tpu.memory_space<vmem>>, %arg9: memref<8x16xf32, #tpu.memory_space<vmem>>) attributes {dimension_semantics = [#tpu.dimension_semantics<parallel>], iteration_bounds = array<i64: 1>, scalar_prefetch = 0 : i64, scratch_operands = 0 : i64, tpu.core_type = #tpu.core_type<tc>, window_params = [{transform_indices = @transform_0, window_bounds = array<i64: 1, 1>}, {transform_indices = @transform_1, window_bounds = array<i64: 8, 32>}, {pipeline_mode = #tpu.pipeline_mode<synchronous>, transform_indices = @transform_2, window_bounds = array<i64: 32, 64>}, {pipeline_mode = #tpu.pipeline_mode<synchronous>, transform_indices = @transform_3, window_bounds = array<i64: 1, 64>}, {pipeline_mode = #tpu.pipeline_mode<synchronous>, transform_indices = @transform_4, window_bounds = array<i64: 64, 48>}, {pipeline_mode = #tpu.pipeline_mode<synchronous>, transform_indices = @transform_5, window_bounds = array<i64: 1, 48>}, {pipeline_mode = #tpu.pipeline_mode<synchronous>, transform_indices = @transform_6, window_bounds = array<i64: 48, 16>}, {pipeline_mode = #tpu.pipeline_mode<synchronous>, transform_indices = @transform_7, window_bounds = array<i64: 1, 16>}, {transform_indices = @transform_8, window_bounds = array<i64: 8, 16>}]} {
    %c0 = arith.constant 0 : index
    %c0_0 = arith.constant 0 : index
    %0 = memref.load %arg1[%c0, %c0_0] : memref<1x1xf32, #tpu.memory_space<smem>>
    %c0_1 = arith.constant 0 : index
    %c0_2 = arith.constant 0 : index
    %1 = vector.load %arg2[%c0_1, %c0_2] : memref<8x32xf32, #tpu.memory_space<vmem>>, vector<8x32xf32>
    %c0_3 = arith.constant 0 : index
    %c0_4 = arith.constant 0 : index
    %2 = vector.load %arg3[%c0_3, %c0_4] : memref<32x64xf32, #tpu.memory_space<vmem>>, vector<32x64xf32>
    %c0_5 = arith.constant 0 : index
    %c0_6 = arith.constant 0 : index
    %3 = vector.load %arg4[%c0_5, %c0_6] : memref<1x64xf32, #tpu.memory_space<vmem>>, vector<1x64xf32>
    %cst = arith.constant dense<0.000000e+00> : vector<8x64xf32>
    %4 = tpu.matmul %1, %2, %cst {dimension_numbers = #tpu.dot_dimension_numbers<[1], [0], [0], [1], [0, 0, 1, 1], [], []>, precision = #tpu.contract_precision<fp32>} : vector<8x32xf32>, vector<32x64xf32>, vector<8x64xf32> -> vector<8x64xf32>
    %5 = vector.broadcast %3 : vector<1x64xf32> to vector<8x64xf32>
    %6 = arith.addf %4, %5 : vector<8x64xf32>
    %cst_7 = arith.constant 0.000000e+00 : f32
    %7 = vector.broadcast %cst_7 : f32 to vector<8x64xf32>
    %8 = arith.maximumf %6, %7 : vector<8x64xf32>
    %c0_8 = arith.constant 0 : index
    %c0_9 = arith.constant 0 : index
    %9 = vector.load %arg5[%c0_8, %c0_9] : memref<64x48xf32, #tpu.memory_space<vmem>>, vector<64x48xf32>
    %c0_10 = arith.constant 0 : index
    %c0_11 = arith.constant 0 : index
    %10 = vector.load %arg6[%c0_10, %c0_11] : memref<1x48xf32, #tpu.memory_space<vmem>>, vector<1x48xf32>
    %cst_12 = arith.constant dense<0.000000e+00> : vector<8x48xf32>
    %11 = tpu.matmul %8, %9, %cst_12 {dimension_numbers = #tpu.dot_dimension_numbers<[1], [0], [0], [1], [0, 0, 1, 1], [], []>, precision = #tpu.contract_precision<fp32>} : vector<8x64xf32>, vector<64x48xf32>, vector<8x48xf32> -> vector<8x48xf32>
    %12 = vector.broadcast %10 : vector<1x48xf32> to vector<8x48xf32>
    %13 = arith.addf %11, %12 : vector<8x48xf32>
    %cst_13 = arith.constant 0.000000e+00 : f32
    %14 = vector.broadcast %cst_13 : f32 to vector<8x48xf32>
    %15 = arith.maximumf %13, %14 : vector<8x48xf32>
    %c0_14 = arith.constant 0 : index
    %c0_15 = arith.constant 0 : index
    %16 = vector.load %arg7[%c0_14, %c0_15] : memref<48x16xf32, #tpu.memory_space<vmem>>, vector<48x16xf32>
    %c0_16 = arith.constant 0 : index
    %c0_17 = arith.constant 0 : index
    %17 = vector.load %arg8[%c0_16, %c0_17] : memref<1x16xf32, #tpu.memory_space<vmem>>, vector<1x16xf32>
    %cst_18 = arith.constant dense<0.000000e+00> : vector<8x16xf32>
    %18 = tpu.matmul %15, %16, %cst_18 {dimension_numbers = #tpu.dot_dimension_numbers<[1], [0], [0], [1], [0, 0, 1, 1], [], []>, precision = #tpu.contract_precision<fp32>} : vector<8x48xf32>, vector<48x16xf32>, vector<8x16xf32> -> vector<8x16xf32>
    %19 = vector.broadcast %17 : vector<1x16xf32> to vector<8x16xf32>
    %20 = arith.addf %18, %19 : vector<8x16xf32>
    %cst_19 = arith.constant 0.000000e+00 : f32
    %21 = vector.broadcast %cst_19 : f32 to vector<8x16xf32>
    %22 = arith.maximumf %20, %21 : vector<8x16xf32>
    %23 = vector.broadcast %0 : f32 to vector<8x16xf32>
    %24 = arith.mulf %22, %23 : vector<8x16xf32>
    %c0_20 = arith.constant 0 : index
    %c0_21 = arith.constant 0 : index
    %25 = vector.load %arg9[%c0_20, %c0_21] : memref<8x16xf32, #tpu.memory_space<vmem>>, vector<8x16xf32>
    tpu.vector_store %arg9[%c0_20, %c0_21], %24 {strides = array<i32>} : memref<8x16xf32, #tpu.memory_space<vmem>>, vector<8x16xf32>,
    return
  }
  func.func @transform_0(%arg0: i32) -> (i32, i32) {
    %c0_i32 = arith.constant 0 : i32
    %c0_i32_0 = arith.constant 0 : i32
    %c0_i32_1 = arith.constant 0 : i32
    return %c0_i32, %c0_i32_0 : i32, i32
  }
  func.func @transform_1(%arg0: i32) -> (i32, i32) {
    %c0_i32 = arith.constant 0 : i32
    %c0_i32_0 = arith.constant 0 : i32
    return %arg0, %c0_i32 : i32, i32
  }
  func.func @transform_2(%arg0: i32) -> (i32, i32) {
    %c0_i32 = arith.constant 0 : i32
    %c0_i32_0 = arith.constant 0 : i32
    %c0_i32_1 = arith.constant 0 : i32
    return %c0_i32, %c0_i32_0 : i32, i32
  }
  func.func @transform_3(%arg0: i32) -> (i32, i32) {
    %c0_i32 = arith.constant 0 : i32
    %c0_i32_0 = arith.constant 0 : i32
    %c0_i32_1 = arith.constant 0 : i32
    return %c0_i32, %c0_i32_0 : i32, i32
  }
  func.func @transform_4(%arg0: i32) -> (i32, i32) {
    %c0_i32 = arith.constant 0 : i32
    %c0_i32_0 = arith.constant 0 : i32
    %c0_i32_1 = arith.constant 0 : i32
    return %c0_i32, %c0_i32_0 : i32, i32
  }
  func.func @transform_5(%arg0: i32) -> (i32, i32) {
    %c0_i32 = arith.constant 0 : i32
    %c0_i32_0 = arith.constant 0 : i32
    %c0_i32_1 = arith.constant 0 : i32
    return %c0_i32, %c0_i32_0 : i32, i32
  }
  func.func @transform_6(%arg0: i32) -> (i32, i32) {
    %c0_i32 = arith.constant 0 : i32
    %c0_i32_0 = arith.constant 0 : i32
    %c0_i32_1 = arith.constant 0 : i32
    return %c0_i32, %c0_i32_0 : i32, i32
  }
  func.func @transform_7(%arg0: i32) -> (i32, i32) {
    %c0_i32 = arith.constant 0 : i32
    %c0_i32_0 = arith.constant 0 : i32
    %c0_i32_1 = arith.constant 0 : i32
    return %c0_i32, %c0_i32_0 : i32, i32
  }
  func.func @transform_8(%arg0: i32) -> (i32, i32) {
    %c0_i32 = arith.constant 0 : i32
    %c0_i32_0 = arith.constant 0 : i32
    return %arg0, %c0_i32 : i32, i32
  }
}

</mosaic_0001>

<bundles_post_ra>
// kernel: tpu_custom_call.1
= control target key start
LH: loop header
LB: loop body
LE: loop exit
PB: predicated region body
PF: predicated region fallthrough
CT: control target
= control target key end

     0   :  { %vm41_vm0 = vcmask 261120   ;;  %s945_s0 = inlined_call_operand.<no memory space> [shape: f32[1,1], index: 0, kind: input, shape index: {}]   ;;  %s946_s1 = inlined_call_operand.vmem [shape: f32[8,32], index: 1, kind: input, shape index: {}]   ;;  %s947_s2 = inlined_call_operand.vmem [shape: f32[32,64], index: 2, kind: input, shape index: {}]   ;;  %s948_s3 = inlined_call_operand.vmem [shape: f32[1,64], index: 3, kind: input, shape index: {}]   ;;  %s949_s4 = inlined_call_operand.vmem [shape: f32[64,48], index: 4, kind: input, shape index: {}]   ;;  %s950_s5 = inlined_call_operand.vmem [shape: f32[1,48], index: 5, kind: input, shape index: {}]   ;;  %s951_s6 = inlined_call_operand.vmem [shape: f32[48,16], index: 6, kind: input, shape index: {}]   ;;  %s952_s7 = inlined_call_operand.vmem [shape: f32[1,16], index: 7, kind: input, shape index: {}]   ;;  %s953_s8 = inlined_call_operand.hbm [shape: f32[8,16], index: 8, kind: output, shape index: {}]  }
   0x1   :  { %v36_v0 = vld [vmem:[%s947_s2 + $0x18] sm:$0xff]  ;;  %v35_v1 = vld [vmem:[%s947_s2 + $0x10] sm:$0xff]  ;;  %v34_v2 = vld [vmem:[%s947_s2 + $0x8] sm:$0xff] }
   0x2   :  { %v816_v3 = vand.u32 4294901760, %v36_v0  ;;  %v818_v4 = vand.u32 4294901760, %v35_v1  ;;  %v820_v5 = vand.u32 4294901760, %v34_v2  ;;  %v33_v6 = vld [vmem:[%s947_s2] sm:$0xff]  ;;  %v238_v8 = vld [vmem:[%s949_s4 + $0x38] sm:$0xff]  ;;  %v237_v12 = vld [vmem:[%s949_s4 + $0x30] sm:$0xff] }
   0x3   :  { %v32_v7 = vld [vmem:[%s946_s1] sm:$0xff]  ;;  %v831_v9 = vand.u32 4294901760, %v33_v6  ;;  %v833_v11 = vand.u32 4294901760, %v238_v8  ;;  %v847_v19 = vand.u32 4294901760, %v237_v12 }
   0x4   :  { %v43_v10 = vsel %vm41_vm0, %v32_v7, 0  ;;  %v87_v13 = vsub.f32 %v36_v0, %v816_v3  ;;  %58 = vmatpush.msra.mxu0 %v816_v3  ;;  %v93_v14 = vsub.f32 %v35_v1, %v818_v4  ;;  %158 = vmatpush.msra.mxu3 %v816_v3  ;;  %v99_v15 = vsub.f32 %v34_v2, %v820_v5 }
   0x5   :  { %v65_v16 = vand.u32 4294901760, %v43_v10  ;;  %v105_v17 = vsub.f32 %v33_v6, %v831_v9  ;;  %v845_v18 = vsub.f32 %v238_v8, %v833_v11 }
   0x6   :  { %14 = vsyncpa [#allocation4], 0  ;;  %129 = vmatpush.msra.mxu2 %v87_v13  ;;  %60 = vmatpush.msra.mxu0 %v818_v4  ;;  %v88_v20 = vand.u32 4294901760, %v87_v13  ;;  %v94_v21 = vand.u32 4294901760, %v93_v14  ;;  %v100_v23 = vand.u32 4294901760, %v99_v15  ;;  %v853_v26 = vsub.f32 %v237_v12, %v847_v19  ;;  %v236_v43 = vld [vmem:[%s949_s4 + $0x28] sm:$0xff] }
   0x7   :  { %v66_v22 = vsub.f32 %v43_v10, %v65_v16  ;;  %160 = vmatpush.msra.mxu3 %v818_v4  ;;  %v106_v24 = vand.u32 4294901760, %v105_v17  ;;  %v290_v25 = vand.u32 4294901760, %v845_v18  ;;  %v879_v44 = vand.u32 4294901760, %v236_v43  ;;  %v235_v45 = vld [vmem:[%s949_s4 + $0x20] sm:$0xff]  ;;  %v234_v48 = vld [vmem:[%s949_s4 + $0x18] sm:$0xff]  ;;  %v233_v52 = vld [vmem:[%s949_s4 + $0x10] sm:$0xff] }
   0x8   :  { %132 = vmatpush.msra.mxu2 %v93_v14  ;;  %v89_v27 = vsub.f32 %v87_v13, %v88_v20  ;;  %62 = vmatpush.msra.mxu0 %v820_v5  ;;  %v95_v28 = vsub.f32 %v93_v14, %v94_v21  ;;  %v101_v29 = vsub.f32 %v99_v15, %v100_v23  ;;  %v296_v32 = vand.u32 4294901760, %v853_v26  ;;  %v232_v57 = vld [vmem:[%s949_s4 + $0x8] sm:$0xff]  ;;  %v231_v63 = vld [vmem:[%s949_s4] sm:$0xff]  ;;  %s761_s21 = smov [#allocation3]   ;;  %s722_s24 = sshll.u32 %s953_s8, 4  ;;  %s723_s24 = int_to_ptr.hbm [resolvable:$true] %s722_s24 }
   0x9   :  { %v67_v30 = vand.u32 4294901760, %v66_v22  ;;  %162 = vmatpush.msra.mxu3 %v820_v5  ;;  %v291_v31 = vsub.f32 %v845_v18, %v290_v25  ;;  %v107_v36 = vsub.f32 %v105_v17, %v106_v24  ;;  %v301_v46 = vsub.f32 %v236_v43, %v879_v44  ;;  %s720_s22 = sshll.u32 %s761_s21, 4  ;;  %s721_s22 = int_to_ptr.vmem [resolvable:$true] %s720_s22 }
   0xa   :  { %v90_v33 = vand.u32 4294901760, %v89_v27  ;;  %135 = vmatpush.msra.mxu2 %v99_v15  ;;  %v96_v34 = vand.u32 4294901760, %v95_v28  ;;  %64 = vmatpush.msra.mxu0 %v831_v9  ;;  %v297_v38 = vsub.f32 %v853_v26, %v296_v32  ;;  %v102_v39 = vand.u32 4294901760, %v101_v29 }
   0xb   :  { %v68_v35 = vsub.f32 %v66_v22, %v67_v30  ;;  %164 = vmatpush.msra.mxu3 %v831_v9  ;;  %v292_v37 = vand.u32 4294901760, %v291_v31  ;;  %v108_v42 = vand.u32 4294901760, %v107_v36  ;;  %v885_v47 = vand.u32 4294901760, %v235_v45 }
   0xc   :  { %187 = vmatpush.msrb.mxu0 %v88_v20  ;;  %91 = vmatpush.msra.mxu1 %v90_v33  ;;  %v298_v41 = vand.u32 4294901760, %v297_v38  ;;  %v302_v49 = vand.u32 4294901760, %v301_v46  ;;  %v263_v51 = vand.u32 4294901760, %v234_v48  ;;  %v265_v56 = vand.u32 4294901760, %v233_v52 }
   0xd   :  { %138 = vmatpush.msra.mxu2 %v105_v17  ;;  %v69_v40 = vand.u32 4294901760, %v68_v35  ;;  %168 = vmatmul.f32.vlgmr.msra.gmra.mxu3 %v67_v30  ;;  %v307_v50 = vsub.f32 %v235_v45, %v885_v47  ;;  %v267_v62 = vand.u32 4294901760, %v232_v57  ;;  %vm243_vm1 = vcmask 523264   ;;  %v490_v35 = vld [vmem:[%s951_s6 + $0x28] sm:$0xff] }
   0xe   :  { %141 = vmatmul.f32.vlgmr.msra.gmra.mxu2 %v66_v22  ;;  %97 = vmatpush.msra.mxu1 %v96_v34  ;;  %v303_v53 = vsub.f32 %v301_v46, %v302_v49  ;;  %v313_v55 = vsub.f32 %v234_v48, %v263_v51  ;;  %v319_v61 = vsub.f32 %v233_v52, %v265_v56  ;;  %v509_v36 = vand.u32 4294901760, %v490_v35 }
   0xf   :  { %70 = vmatmul.f32.vlgmr.msra.gmra.mxu0 %v69_v40  ;;  %293 = vmatpush.msrb.mxu3 %v292_v37  ;;  %v308_v54 = vand.u32 4294901760, %v307_v50  ;;  %v489_v37 = vld [vmem:[%s951_s6 + $0x20] sm:$0xff]  ;;  %v488_v40 = vld [vmem:[%s951_s6 + $0x18] sm:$0xff]  ;;  %vm495_vm2 = vcmask 392192   ;;  %vm713_vm3 = vcmask 130048  }
  0x10   :  { %191 = vmatpush.msrb.mxu0 %v94_v21  ;;  %103 = vmatpush.msra.mxu1 %v102_v39  ;;  %v304_v58 = vand.u32 4294901760, %v303_v53  ;;  %v314_v60 = vand.u32 4294901760, %v313_v55  ;;  %v320_v2 = vand.u32 4294901760, %v319_v61  ;;  %v541_v38 = vsub.f32 %v490_v35, %v509_v36 }
  0x11   :  { %256 = vmatpush.msrb.mxu2 %v833_v11  ;;  %299 = vmatpush.msrb.mxu3 %v298_v41  ;;  %v309_v59 = vsub.f32 %v307_v50, %v308_v54  ;;  %v511_v39 = vand.u32 4294901760, %v489_v37  ;;  %v513_v43 = vand.u32 4294901760, %v488_v40 }
  0x12   :  { %195 = vmatpush.msrb.mxu0 %v100_v23  ;;  %109 = vmatpush.msra.mxu1 %v108_v42  ;;  %v315_v1 = vsub.f32 %v313_v55, %v314_v60  ;;  %v321_v6 = vsub.f32 %v319_v61, %v320_v2  ;;  %v542_v41 = vand.u32 4294901760, %v541_v38 }
  0x13   :  { %258 = vmatpush.msrb.mxu2 %v847_v19  ;;  %111 = vmatmul.f32.vlgmr.msra.gmra.mxu1 %v65_v16  ;;  %v310_v0 = vand.u32 4294901760, %v309_v59  ;;  %v547_v42 = vsub.f32 %v489_v37, %v511_v39 }
  0x14   :  { %199 = vmatpush.msrb.mxu0 %v106_v24  ;;  %218 = vmatpush.msrb.mxu1 %v816_v3  ;;  %v269_v3 = vand.u32 4294901760, %v231_v63  ;;  %v543_v45 = vsub.f32 %v541_v38, %v542_v41 }
  0x15   :  { %260 = vmatpush.msrb.mxu2 %v879_v44  ;;  %305 = vmatpush.msrb.mxu3 %v304_v58 }
  0x16   :  { %351 = vmatpush.msra.mxu0 %v845_v18  ;;  %220 = vmatpush.msrb.mxu1 %v818_v4  ;;  %v325_v4 = vsub.f32 %v232_v57, %v267_v62  ;;  %v331_v7 = vsub.f32 %v231_v63, %v269_v3 }
  0x17   :  { %201 = vmatmul.f32.vlgmr.msrb.gmra.mxu0 %v65_v16  ;;  %262 = vmatpush.msrb.mxu2 %v885_v47 }
  0x18   :  { %354 = vmatpush.msra.mxu0 %v853_v26  ;;  %222 = vmatpush.msrb.mxu1 %v820_v5  ;;  %v316_v5 = vand.u32 4294901760, %v315_v1  ;;  %v326_v8 = vand.u32 4294901760, %v325_v4  ;;  %v332_v10 = vand.u32 4294901760, %v331_v7 }
  0x19   :  { %264 = vmatpush.msrb.mxu2 %v263_v51  ;;  %311 = vmatpush.msrb.mxu3 %v310_v0 }
  0x1a   :  { %224 = vmatpush.msrb.mxu1 %v831_v9  ;;  %357 = vmatpush.msra.mxu0 %v301_v46  ;;  %v322_v9 = vand.u32 4294901760, %v321_v6  ;;  %v327_v12 = vsub.f32 %v325_v4, %v326_v8  ;;  %v333_v13 = vsub.f32 %v331_v7, %v332_v10  ;;  %v548_v46 = vand.u32 4294901760, %v547_v42 }
  0x1b   :  { %226 = vmatmul.f32.vlgmr.msrb.gmra.mxu1 %v65_v16  ;;  %266 = vmatpush.msrb.mxu2 %v265_v56  ;;  %v732_v16 = vld [vmem:[%s948_s3] ss:$0 sm:$0xff] }
  0x1c   :  { %388 = vmatpush.msra.mxu1 %v833_v11  ;;  %360 = vmatpush.msra.mxu0 %v307_v50  ;;  %v328_v14 = vand.u32 4294901760, %v327_v12  ;;  %v334_v15 = vand.u32 4294901760, %v333_v13  ;;  %v544_v50 = vand.u32 4294901760, %v543_v45 }
  0x1d   :  { %268 = vmatpush.msrb.mxu2 %v267_v62  ;;  %317 = vmatpush.msrb.mxu3 %v316_v5 }
  0x1e   :  { %390 = vmatpush.msra.mxu1 %v847_v19  ;;  %363 = vmatpush.msra.mxu0 %v313_v55  ;;  %v485_v55 = vld [vmem:[%s951_s6] sm:$0xff] }
  0x1f   :  { %270 = vmatpush.msrb.mxu2 %v269_v3  ;;  %323 = vmatpush.msrb.mxu3 %v322_v9  ;;  %v519_v59 = vand.u32 4294901760, %v485_v55 }
  0x20   :  { %392 = vmatpush.msra.mxu1 %v879_v44  ;;  %366 = vmatpush.msra.mxu0 %v319_v61 }
  0x21   :  { %421 = vmatpush.msra.mxu2 %v290_v25  ;;  %329 = vmatpush.msrb.mxu3 %v328_v14  ;;  %v571_v63 = vsub.f32 %v485_v55, %v519_v59 }
  0x22   :  { %394 = vmatpush.msra.mxu1 %v885_v47  ;;  %369 = vmatpush.msra.mxu0 %v325_v4 }
  0x23   :  { %425 = vmatpush.msra.mxu2 %v296_v32  ;;  %335 = vmatpush.msrb.mxu3 %v334_v15 }
  0x24   :  { %396 = vmatpush.msra.mxu1 %v263_v51  ;;  %372 = vmatpush.msra.mxu0 %v331_v7  ;;  %v733_v7 = vld [vmem:[%s950_s5] ss:$0 sm:$0xff] }
  0x25   :  { %429 = vmatpush.msra.mxu2 %v302_v49  ;;  %464 = vmatpush.msra.mxu3 %v833_v11  ;;  %v486_v49 = vld [vmem:[%s951_s6 + $0x8] sm:$0xff] }
  0x26   :  { %398 = vmatpush.msra.mxu1 %v265_v56  ;;  %510 = vmatpush.msrb.mxu0 %v509_v36 }
  0x27   :  { %433 = vmatpush.msra.mxu2 %v308_v54  ;;  %466 = vmatpush.msra.mxu3 %v847_v19  ;;  %v517_v54 = vand.u32 4294901760, %v486_v49 }
  0x28   :  { %400 = vmatpush.msra.mxu1 %v267_v62  ;;  %512 = vmatpush.msrb.mxu0 %v511_v39 }
  0x29   :  { %437 = vmatpush.msra.mxu2 %v314_v60  ;;  %468 = vmatpush.msra.mxu3 %v879_v44  ;;  %v487_v44 = vld [vmem:[%s951_s6 + $0x10] sm:$0xff]  ;;  %v565_v60 = vsub.f32 %v486_v49, %v517_v54 }
  0x2a   :  { %402 = vmatpush.msra.mxu1 %v269_v3  ;;  %v515_v48 = vand.u32 4294901760, %v487_v44  ;;  %514 = vmatpush.msrb.mxu0 %v513_v43 }
  0x2b   :  { %441 = vmatpush.msra.mxu2 %v320_v2  ;;  %470 = vmatpush.msra.mxu3 %v885_v47  ;;  %v553_v47 = vsub.f32 %v488_v40, %v513_v43  ;;  %v566_v0 = vand.u32 4294901760, %v565_v60  ;;  %v572_v2 = vand.u32 4294901760, %v571_v63  ;;  %v711_v40 = vstv %s945_s0 }
  0x2c   :  { %v559_v53 = vsub.f32 %v487_v44, %v515_v48  ;;  %516 = vmatpush.msrb.mxu0 %v515_v48  ;;  %545 = vmatpush.msrb.mxu1 %v544_v50 }
  0x2d   :  { %445 = vmatpush.msra.mxu2 %v326_v8  ;;  %472 = vmatpush.msra.mxu3 %v263_v51  ;;  %v549_v51 = vsub.f32 %v547_v42, %v548_v46  ;;  %v554_v52 = vand.u32 4294901760, %v553_v47  ;;  %v573_v4 = vsub.f32 %v571_v63, %v572_v2 }
  0x2e   :  { %v560_v58 = vand.u32 4294901760, %v559_v53  ;;  %518 = vmatpush.msrb.mxu0 %v517_v54 }
  0x2f   :  { %449 = vmatpush.msra.mxu2 %v332_v10  ;;  %474 = vmatpush.msra.mxu3 %v265_v56  ;;  %v550_v56 = vand.u32 4294901760, %v549_v51  ;;  %v555_v57 = vsub.f32 %v553_v47, %v554_v52  ;;  %v574_v6 = vand.u32 4294901760, %v573_v4 }
  0x30   :  { %520 = vmatpush.msrb.mxu0 %v519_v59 }
  0x31   :  { %476 = vmatpush.msra.mxu3 %v267_v62  ;;  %551 = vmatpush.msrb.mxu1 %v550_v56  ;;  %v556_v61 = vand.u32 4294901760, %v555_v57  ;;  %v561_v62 = vsub.f32 %v559_v53, %v560_v58 }
  0x33   :  { %478 = vmatpush.msra.mxu3 %v269_v3  ;;  %557 = vmatpush.msrb.mxu1 %v556_v61  ;;  %v562_v1 = vand.u32 4294901760, %v561_v62  ;;  %v567_v3 = vsub.f32 %v565_v60, %v566_v0 }
  0x35   :  { %563 = vmatpush.msrb.mxu1 %v562_v1  ;;  %v568_v5 = vand.u32 4294901760, %v567_v3 }
  0x37   :  { %569 = vmatpush.msrb.mxu1 %v568_v5 }
  0x39   :  { %575 = vmatpush.msrb.mxu1 %v574_v6 }
  0x8c   :  { %v71_v17 = vpop.f32.mrf.mxu0 }
  0x8d   :  { %v72_v11 = vadd.f32 %v732_v16, %v71_v17 }
  0x90   :  { %v112_v18 = vpop.f32.mrf.mxu1  ;;  %v169_v21 = vpop.f32.mrf.mxu3 }
  0x91   :  { %v142_v20 = vpop.f32.mrf.mxu2  ;;  %v113_v19 = vadd.f32 %v112_v18, %v72_v11 }
  0x93   :  { %v143_v22 = vadd.f32 %v142_v20, %v113_v19 }
  0x94   :  { %v202_v23 = vpop.f32.mrf.mxu0 }
  0x95   :  { %v170_v24 = vadd.f32 %v169_v21, %v143_v22 }
  0x97   :  { %v203_v25 = vadd.f32 %v202_v23, %v170_v24 }
  0x98   :  { %v227_v26 = vpop.f32.mrf.mxu1 }
  0x99   :  { %v228_v27 = vadd.f32 %v227_v26, %v203_v25 }
  0x9b   :  { %v230_v28 = vmax.f32 %v228_v27, 0.0  ;;  %v734_v27 = vld [vmem:[%s952_s7] ss:$0 sm:$0xff] }
  0x9d   :  { %v245_v29 = vsel %vm243_vm1, %v230_v28, 0 }
  0x9e   :  { %v271_v30 = vand.u32 4294901760, %v245_v29 }
  0xa0   :  { %v272_v31 = vsub.f32 %v245_v29, %v271_v30  ;;  %337 = vmatmul.f32.vlgmr.msrb.gmra.mxu3 %v271_v30 }
  0xa1   :  { %626 = vmatpush.msrb.mxu3 %v509_v36 }
  0xa2   :  { %375 = vmatmul.f32.vlgmr.msra.gmra.mxu0 %v272_v31  ;;  %v273_v32 = vand.u32 4294901760, %v272_v31 }
  0xa3   :  { %628 = vmatpush.msrb.mxu3 %v511_v39  ;;  %657 = vmatpush.msra.mxu0 %v542_v41 }
  0xa4   :  { %406 = vmatmul.f32.vlgmr.msra.gmra.mxu1 %v273_v32  ;;  %v274_v33 = vsub.f32 %v272_v31, %v273_v32 }
  0xa5   :  { %630 = vmatpush.msrb.mxu3 %v513_v43  ;;  %661 = vmatpush.msra.mxu0 %v548_v46 }
  0xa6   :  { %v275_v34 = vand.u32 4294901760, %v274_v33  ;;  %694 = vmatpush.msra.mxu1 %v509_v36 }
  0xa7   :  { %632 = vmatpush.msrb.mxu3 %v515_v48  ;;  %665 = vmatpush.msra.mxu0 %v554_v52 }
  0xa8   :  { %276 = vmatmul.f32.vlgmr.msrb.gmra.mxu2 %v275_v34  ;;  %480 = vmatmul.f32.vlgmr.msra.gmra.mxu3 %v271_v30 }
  0xa9   :  { %593 = vmatpush.msrb.mxu2 %v541_v38  ;;  %634 = vmatpush.msrb.mxu3 %v517_v54 }
  0xaa   :  { %669 = vmatpush.msra.mxu0 %v560_v58  ;;  %696 = vmatpush.msra.mxu1 %v511_v39 }
  0xab   :  { %596 = vmatpush.msrb.mxu2 %v547_v42  ;;  %636 = vmatpush.msrb.mxu3 %v519_v59 }
  0xac   :  { %673 = vmatpush.msra.mxu0 %v566_v0  ;;  %698 = vmatpush.msra.mxu1 %v513_v43 }
  0xad   :  { %599 = vmatpush.msrb.mxu2 %v553_v47 }
  0xae   :  { %677 = vmatpush.msra.mxu0 %v572_v2  ;;  %700 = vmatpush.msra.mxu1 %v515_v48 }
  0xaf   :  { %602 = vmatpush.msrb.mxu2 %v559_v53 }
  0xb0   :  { %451 = vmatmul.f32.vlgmr.msra.gmra.mxu2 %v271_v30  ;;  %702 = vmatpush.msra.mxu1 %v517_v54 }
  0xb1   :  { %605 = vmatpush.msrb.mxu2 %v565_v60 }
  0xb2   :  { %704 = vmatpush.msra.mxu1 %v519_v59 }
  0xb3   :  { %608 = vmatpush.msrb.mxu2 %v571_v63 }
 0x11f   :  { %v376_v13 = vpop.f32.mrf.mxu0 }
 0x121   :  { %v407_v15 = vpop.f32.mrf.mxu1 }
 0x123   :  { %v338_v8 = vpop.f32.mrf.mxu3 }
 0x12b   :  { %v277_v9 = vpop.f32.mrf.mxu2  ;;  %v481_v18 = vpop.f32.mrf.mxu3 }
 0x12c   :  { %v278_v10 = vadd.f32 %v733_v7, %v277_v9 }
 0x12e   :  { %v339_v12 = vadd.f32 %v338_v8, %v278_v10 }
 0x130   :  { %v377_v14 = vadd.f32 %v376_v13, %v339_v12 }
 0x132   :  { %v408_v16 = vadd.f32 %v407_v15, %v377_v14 }
 0x133   :  { %v452_v17 = vpop.f32.mrf.mxu2 }
 0x134   :  { %v453_v11 = vadd.f32 %v452_v17, %v408_v16 }
 0x136   :  { %v482_v20 = vadd.f32 %v481_v18, %v453_v11 }
 0x138   :  { %v484_v19 = vmax.f32 %v482_v20, 0.0 }
 0x13a   :  { %v497_v21 = vsel %vm495_vm2, %v484_v19, 0 }
 0x13b   :  { %v521_v22 = vand.u32 4294901760, %v497_v21 }
 0x13d   :  { %v522_v23 = vsub.f32 %v497_v21, %v521_v22  ;;  %577 = vmatmul.f32.vlgmr.msrb.gmra.mxu1 %v521_v22 }
 0x13f   :  { %611 = vmatmul.f32.vlgmr.msrb.gmra.mxu2 %v522_v23  ;;  %v523_v24 = vand.u32 4294901760, %v522_v23 }
 0x141   :  { %640 = vmatmul.f32.vlgmr.msrb.gmra.mxu3 %v523_v24  ;;  %v524_v25 = vsub.f32 %v522_v23, %v523_v24 }
 0x143   :  { %v525_v26 = vand.u32 4294901760, %v524_v25 }
 0x145   :  { %526 = vmatmul.f32.vlgmr.msrb.gmra.mxu0 %v525_v26  ;;  %706 = vmatmul.f32.vlgmr.msra.gmra.mxu1 %v521_v22 }
 0x14d   :  { %679 = vmatmul.f32.vlgmr.msra.gmra.mxu0 %v521_v22 }
 0x1ba   :  { %v578_v28 = vpop.f32.mrf.mxu1 }
 0x1c2   :  { %v527_v29 = vpop.f32.mrf.mxu0  ;;  %v612_v32 = vpop.f32.mrf.mxu2 }
 0x1c3   :  { %v528_v30 = vadd.f32 %v734_v27, %v527_v29  ;;  %v707_v38 = vpop.f32.mrf.mxu1 }
 0x1c4   :  { %v641_v34 = vpop.f32.mrf.mxu3 }
 0x1c5   :  { %v579_v31 = vadd.f32 %v578_v28, %v528_v30 }
 0x1c7   :  { %v613_v33 = vadd.f32 %v612_v32, %v579_v31 }
 0x1c9   :  { %v642_v35 = vadd.f32 %v641_v34, %v613_v33 }
 0x1ca   :  { %v680_v36 = vpop.f32.mrf.mxu0 }
 0x1cb   :  { %v681_v37 = vadd.f32 %v680_v36, %v642_v35 }
 0x1cd   :  { %v708_v39 = vadd.f32 %v707_v38, %v681_v37 }
 0x1cf   :  { %v710_v41 = vmax.f32 %v708_v39, 0.0 }
 0x1d1   :  { %v712_v42 = vmul.f32 %v711_v40, %v710_v41 }
 0x1d3   :  { %714 = vst.msk [vmem:[#allocation3] sm:$0xff] %vm713_vm3, %v712_v42 }
 0x1d4   :  { %725 = dma.vmem_to_hbm [thread:$0]  %s721_s22, 128, %s723_s24, [#allocation4]  }
 0x1d5   :  { %759 = dma.done.wait [#allocation4], 128  }
 0x1d6   :  { %760 = vsyncadd [#allocation4], 4294967168 }
 0x1d7   :  { %730 = vsyncpa [#allocation4], 1 }

</bundles_post_ra>
